<compile_context>
chip_gen: v6e
topology: v6e:2x2x1
jax: 0.10.0
libtpu: 0.0.40
codegen_flags: <defaults>
</compile_context>

<pallas_src>
import functools

import jax
import jax.numpy as jnp
from jax.experimental import pallas as pl
from jax.experimental.pallas import tpu as pltpu

HIDDEN = 128
ACTION_PAD = 128  # lane-dense padded width of the final matmul (compute only)


def _policy_mlp_kernel(x_ref, w1_ref, b1_ref, w2_ref, b2_ref, w3_ref, b3_ref,
                       out_ref, *, num_actions):
    # state arrives f32; cast to bf16 in-kernel (free VPU filler, saves an
    # extra HBM round trip vs. a standalone cast op).
    x = x_ref[...].astype(jnp.bfloat16)

    # linear1 + relu   (f32 accumulation on the MXU)
    h1 = jnp.dot(x, w1_ref[...], preferred_element_type=jnp.float32)
    h1 = jnp.maximum(h1 + b1_ref[...], 0.0)

    # linear2 + relu
    h2 = jnp.dot(h1.astype(jnp.bfloat16), w2_ref[...],
                 preferred_element_type=jnp.float32)
    h2 = jnp.maximum(h2 + b2_ref[...], 0.0)

    # linear3, computed on a 128-lane padded tile for the MXU; padded lanes are
    # masked to -inf so exp() underflows them to exactly 0 in the softmax.
    logits = jnp.dot(h2.astype(jnp.bfloat16), w3_ref[...],
                     preferred_element_type=jnp.float32)
    logits = logits + b3_ref[...]

    lane = jax.lax.broadcasted_iota(jnp.int32, logits.shape, dimension=1)
    logits = jnp.where(lane < num_actions, logits, -1e30)

    m = jnp.max(logits, axis=-1, keepdims=True)
    e = jnp.exp(logits - m)                       # padded lanes -> 0
    denom = jnp.sum(e, axis=-1, keepdims=True)
    probs = e / denom                             # exact: rows sum to 1

    # Store only the real actions (narrow masked store beats 16x output bytes).
    out_ref[...] = probs[:, :num_actions].astype(out_ref.dtype)


def prepare_params(params):
    """One-time (per parameter update) device-side prep:
    bf16 weights for the MXU, layer-3 weight/bias zero-padded to 128 lanes."""
    H = params["w1"].shape[1]
    num_actions = int(params["w3"].shape[1])
    w3p = jnp.zeros((H, ACTION_PAD), jnp.float32).at[:, :num_actions].set(params["w3"])
    b3p = jnp.zeros((1, ACTION_PAD), jnp.float32).at[:, :num_actions].set(params["b3"])
    return {
        "w1": params["w1"].astype(jnp.bfloat16),
        "b1": params["b1"].astype(jnp.float32),
        "w2": params["w2"].astype(jnp.bfloat16),
        "b2": params["b2"].astype(jnp.float32),
        "w3": w3p.astype(jnp.bfloat16),
        "b3": b3p,
        "num_actions": num_actions,
    }


def _choose_tile(b_pad8, tile_b):
    tile_b = max(8, (int(tile_b) // 8) * 8)   # sublane alignment
    tile_b = min(tile_b, b_pad8)
    # Ensure >=2 grid steps when the batch allows, so ("parallel",) can shard
    # the batch across both TensorCores on v7x (no-op on v5e/v6e).
    if b_pad8 >= 16:
        half = ((-(-b_pad8 // 2)) + 7) // 8 * 8
        tile_b = min(tile_b, half)
    return tile_b


def policy_network_forward(state, prepared, *, tile_b=1024):
    """state: (B, num_inputs) f32.  prepared: output of prepare_params()."""
    B, num_inputs = state.shape
    H = prepared["w1"].shape[1]
    num_actions = prepared["num_actions"]
    assert H == HIDDEN

    w1, b1 = prepared["w1"], prepared["b1"]
    w2, b2 = prepared["w2"], prepared["b2"]
    w3, b3 = prepared["w3"], prepared["b3"]

    # ---- batch tiling: pad B up to a multiple of the tile --------------------
    b_pad8 = ((B + 7) // 8) * 8
    tile_b = _choose_tile(b_pad8, tile_b)
    b_padded = ((b_pad8 + tile_b - 1) // tile_b) * tile_b
    grid = (b_padded // tile_b,)

    x = state
    if b_padded != B:
        # Padded rows just compute a softmax over bias-only logits (harmless,
        # sliced off below).
        x = jnp.pad(x, ((0, b_padded - B), (0, 0)))

    const = lambda i: (0, 0)      # weights/biases: same block every step -> resident
    batch = lambda i: (i, 0)      # state/output: walk the batch

    flops = 2 * b_padded * (num_inputs * H + H * H + H * ACTION_PAD)
    bytes_accessed = (x.size * 4
                      + (w1.size + w2.size + w3.size) * 2
                      + (b1.size + b2.size + b3.size) * 4
                      + b_padded * num_actions * 4)

    kernel = functools.partial(_policy_mlp_kernel, num_actions=num_actions)

    probs = pl.pallas_call(
        kernel,
        out_shape=jax.ShapeDtypeStruct((b_padded, num_actions), jnp.float32),
        grid=grid,
        in_specs=[
            pl.BlockSpec((tile_b, num_inputs), batch),   # state (f32)
            pl.BlockSpec((num_inputs, H), const),        # w1 (bf16)
            pl.BlockSpec((1, H), const),                 # b1
            pl.BlockSpec((H, H), const),                 # w2 (bf16)
            pl.BlockSpec((1, H), const),                 # b2
            pl.BlockSpec((H, ACTION_PAD), const),        # w3 (bf16, padded)
            pl.BlockSpec((1, ACTION_PAD), const),        # b3 (padded)
        ],
        out_specs=pl.BlockSpec((tile_b, num_actions), batch),
        compiler_params=pltpu.CompilerParams(
            dimension_semantics=("parallel",),
            vmem_limit_bytes=32 * 1024 * 1024,
        ),
        cost_estimate=pl.CostEstimate(
            flops=flops,
            transcendentals=b_padded * ACTION_PAD,
            bytes_accessed=bytes_accessed,
        ),
    )(x, w1, b1, w2, b2, w3, b3)

    return probs if b_padded == B else probs[:B]


def init_params(key, num_inputs, num_actions, hidden=HIDDEN):
    """Deterministic init mimicking nn.Linear's U(-1/sqrt(fan_in), 1/sqrt(fan_in))."""
    ks = jax.random.split(key, 6)

    def linear(kw, kb, fan_in, fan_out):
        bound = 1.0 / jnp.sqrt(jnp.float32(fan_in))
        w = jax.random.uniform(kw, (fan_in, fan_out), jnp.float32, -bound, bound)
        b = jax.random.uniform(kb, (1, fan_out), jnp.float32, -bound, bound)
        return w, b

    w1, b1 = linear(ks[0], ks[1], num_inputs, hidden)
    w2, b2 = linear(ks[2], ks[3], hidden, hidden)
    w3, b3 = linear(ks[4], ks[5], hidden, num_actions)
    return {"w1": w1, "b1": b1, "w2": w2, "b2": b2, "w3": w3, "b3": b3}


def reference_forward(state, params):
    """Pure-JAX reference with the same bf16-operand / f32-accumulate numerics."""
    bf = lambda a: a.astype(jnp.bfloat16).astype(jnp.float32)
    h1 = jnp.maximum(jnp.dot(bf(state), bf(params["w1"])) + params["b1"], 0.0)
    h2 = jnp.maximum(jnp.dot(bf(h1), bf(params["w2"])) + params["b2"], 0.0)
    logits = jnp.dot(bf(h2), bf(params["w3"])) + params["b3"]
    return jax.nn.softmax(logits, axis=1)


if __name__ == "__main__":
    key = jax.random.PRNGKey(0)
    k_params, k_state1, k_state2 = jax.random.split(key, 3)

    num_inputs, num_actions = 32, 8
    params = init_params(k_params, num_inputs, num_actions)
    prepared = prepare_params(params)   # once per parameter update, not per call

    # Small batch (single grid step).
    B1 = 8
    state1 = jax.random.normal(k_state1, (B1, num_inputs), jnp.float32)
    probs1 = jax.block_until_ready(policy_network_forward(state1, prepared))
    ref1 = reference_forward(state1, params)
    assert probs1.shape == (B1, num_actions)
    assert jnp.allclose(jnp.sum(probs1, axis=1), 1.0, atol=2e-3)
    assert jnp.allclose(probs1, ref1, atol=5e-3, rtol=5e-3)

    # Ragged batch exercising the grid + batch padding path (multi-step grid).
    B2 = 37
    state2 = jax.random.normal(k_state2, (B2, num_inputs), jnp.float32)
    probs2 = jax.block_until_ready(
        policy_network_forward(state2, prepared, tile_b=16))
    ref2 = reference_forward(state2, params)
    assert probs2.shape == (B2, num_actions)
    assert jnp.allclose(jnp.sum(probs2, axis=1), 1.0, atol=2e-3)
    assert jnp.allclose(probs2, ref2, atol=5e-3, rtol=5e-3)

    print("KERNEL_OK")
</pallas_src>

<mosaic_0001>
module attributes {stable_mosaic.version = 11 : i64} {
  func.func @_policy_mlp_kernel(%arg0: i32, %arg1: memref<8x32xf32, #tpu.memory_space<vmem>>, %arg2: memref<32x128xbf16, #tpu.memory_space<vmem>>, %arg3: memref<1x128xf32, #tpu.memory_space<vmem>>, %arg4: memref<128x128xbf16, #tpu.memory_space<vmem>>, %arg5: memref<1x128xf32, #tpu.memory_space<vmem>>, %arg6: memref<128x128xbf16, #tpu.memory_space<vmem>>, %arg7: memref<1x128xf32, #tpu.memory_space<vmem>>, %arg8: memref<8x8xf32, #tpu.memory_space<vmem>>) attributes {dimension_semantics = [#tpu.dimension_semantics<parallel>], iteration_bounds = array<i64: 1>, scalar_prefetch = 0 : i64, scratch_operands = 0 : i64, tpu.core_type = #tpu.core_type<tc>, window_params = [{transform_indices = @transform_0, window_bounds = array<i64: 8, 32>}, {pipeline_mode = #tpu.pipeline_mode<synchronous>, transform_indices = @transform_1, window_bounds = array<i64: 32, 128>}, {pipeline_mode = #tpu.pipeline_mode<synchronous>, transform_indices = @transform_2, window_bounds = array<i64: 1, 128>}, {pipeline_mode = #tpu.pipeline_mode<synchronous>, transform_indices = @transform_3, window_bounds = array<i64: 128, 128>}, {pipeline_mode = #tpu.pipeline_mode<synchronous>, transform_indices = @transform_4, window_bounds = array<i64: 1, 128>}, {pipeline_mode = #tpu.pipeline_mode<synchronous>, transform_indices = @transform_5, window_bounds = array<i64: 128, 128>}, {pipeline_mode = #tpu.pipeline_mode<synchronous>, transform_indices = @transform_6, window_bounds = array<i64: 1, 128>}, {transform_indices = @transform_7, window_bounds = array<i64: 8, 8>}]} {
    %c0 = arith.constant 0 : index
    %c0_0 = arith.constant 0 : index
    %0 = vector.load %arg1[%c0, %c0_0] : memref<8x32xf32, #tpu.memory_space<vmem>>, vector<8x32xf32>
    %1 = arith.truncf %0 : vector<8x32xf32> to vector<8x32xbf16>
    %c0_1 = arith.constant 0 : index
    %c0_2 = arith.constant 0 : index
    %2 = vector.load %arg2[%c0_1, %c0_2] : memref<32x128xbf16, #tpu.memory_space<vmem>>, vector<32x128xbf16>
    %cst = arith.constant dense<0.000000e+00> : vector<8x128xf32>
    %3 = tpu.matmul %1, %2, %cst {dimension_numbers = #tpu.dot_dimension_numbers<[1], [0], [0], [1], [0, 0, 1, 1], [], []>} : vector<8x32xbf16>, vector<32x128xbf16>, vector<8x128xf32> -> vector<8x128xf32>
    %c0_3 = arith.constant 0 : index
    %c0_4 = arith.constant 0 : index
    %4 = vector.load %arg3[%c0_3, %c0_4] : memref<1x128xf32, #tpu.memory_space<vmem>>, vector<1x128xf32>
    %5 = vector.broadcast %4 : vector<1x128xf32> to vector<8x128xf32>
    %6 = arith.addf %3, %5 : vector<8x128xf32>
    %cst_5 = arith.constant 0.000000e+00 : f32
    %7 = vector.broadcast %cst_5 : f32 to vector<8x128xf32>
    %8 = arith.maximumf %6, %7 : vector<8x128xf32>
    %9 = arith.truncf %8 : vector<8x128xf32> to vector<8x128xbf16>
    %c0_6 = arith.constant 0 : index
    %c0_7 = arith.constant 0 : index
    %10 = vector.load %arg4[%c0_6, %c0_7] : memref<128x128xbf16, #tpu.memory_space<vmem>>, vector<128x128xbf16>
    %cst_8 = arith.constant dense<0.000000e+00> : vector<8x128xf32>
    %11 = tpu.matmul %9, %10, %cst_8 {dimension_numbers = #tpu.dot_dimension_numbers<[1], [0], [0], [1], [0, 0, 1, 1], [], []>} : vector<8x128xbf16>, vector<128x128xbf16>, vector<8x128xf32> -> vector<8x128xf32>
    %c0_9 = arith.constant 0 : index
    %c0_10 = arith.constant 0 : index
    %12 = vector.load %arg5[%c0_9, %c0_10] : memref<1x128xf32, #tpu.memory_space<vmem>>, vector<1x128xf32>
    %13 = vector.broadcast %12 : vector<1x128xf32> to vector<8x128xf32>
    %14 = arith.addf %11, %13 : vector<8x128xf32>
    %cst_11 = arith.constant 0.000000e+00 : f32
    %15 = vector.broadcast %cst_11 : f32 to vector<8x128xf32>
    %16 = arith.maximumf %14, %15 : vector<8x128xf32>
    %17 = arith.truncf %16 : vector<8x128xf32> to vector<8x128xbf16>
    %c0_12 = arith.constant 0 : index
    %c0_13 = arith.constant 0 : index
    %18 = vector.load %arg6[%c0_12, %c0_13] : memref<128x128xbf16, #tpu.memory_space<vmem>>, vector<128x128xbf16>
    %cst_14 = arith.constant dense<0.000000e+00> : vector<8x128xf32>
    %19 = tpu.matmul %17, %18, %cst_14 {dimension_numbers = #tpu.dot_dimension_numbers<[1], [0], [0], [1], [0, 0, 1, 1], [], []>} : vector<8x128xbf16>, vector<128x128xbf16>, vector<8x128xf32> -> vector<8x128xf32>
    %c0_15 = arith.constant 0 : index
    %c0_16 = arith.constant 0 : index
    %20 = vector.load %arg7[%c0_15, %c0_16] : memref<1x128xf32, #tpu.memory_space<vmem>>, vector<1x128xf32>
    %21 = vector.broadcast %20 : vector<1x128xf32> to vector<8x128xf32>
    %22 = arith.addf %19, %21 : vector<8x128xf32>
    %23 = tpu.iota {dimensions = array<i32: 1>} : vector<8x128xi32>
    %c8_i32 = arith.constant 8 : i32
    %24 = vector.broadcast %c8_i32 : i32 to vector<8x128xi32>
    %25 = arith.cmpi slt, %23, %24 : vector<8x128xi32>
    %cst_17 = arith.constant -1.000000e+30 : f32
    %26 = vector.broadcast %cst_17 : f32 to vector<8x128xf32>
    %27 = arith.select %25, %22, %26 : vector<8x128xi1>, vector<8x128xf32>
    %cst_18 = arith.constant dense<0xFF800000> : vector<8xf32>
    %28 = vector.multi_reduction <maximumf>, %27, %cst_18 [1] : vector<8x128xf32> to vector<8xf32>
    %29 = vector.shape_cast %28 : vector<8xf32> to vector<8x1xf32>
    %30 = vector.broadcast %29 : vector<8x1xf32> to vector<8x128xf32>
    %31 = arith.subf %27, %30 : vector<8x128xf32>
    %32 = math.exp %31 : vector<8x128xf32>
    %cst_19 = arith.constant dense<0.000000e+00> : vector<8xf32>
    %33 = vector.multi_reduction <add>, %32, %cst_19 [1] : vector<8x128xf32> to vector<8xf32>
    %34 = vector.shape_cast %33 : vector<8xf32> to vector<8x1xf32>
    %35 = vector.broadcast %34 : vector<8x1xf32> to vector<8x128xf32>
    %36 = arith.divf %32, %35 : vector<8x128xf32>
    %37 = vector.extract_strided_slice %36 {offsets = [0, 0], sizes = [8, 8], strides = [1, 1]} : vector<8x128xf32> to vector<8x8xf32>
    %c0_20 = arith.constant 0 : index
    %c0_21 = arith.constant 0 : index
    %38 = vector.load %arg8[%c0_20, %c0_21] : memref<8x8xf32, #tpu.memory_space<vmem>>, vector<8x8xf32>
    tpu.vector_store %arg8[%c0_20, %c0_21], %37 {strides = array<i32>} : memref<8x8xf32, #tpu.memory_space<vmem>>, vector<8x8xf32>,
    return
  }
  func.func @transform_0(%arg0: i32) -> (i32, i32) {
    %c0_i32 = arith.constant 0 : i32
    %c0_i32_0 = arith.constant 0 : i32
    return %arg0, %c0_i32 : i32, i32
  }
  func.func @transform_1(%arg0: i32) -> (i32, i32) {
    %c0_i32 = arith.constant 0 : i32
    %c0_i32_0 = arith.constant 0 : i32
    %c0_i32_1 = arith.constant 0 : i32
    return %c0_i32, %c0_i32_0 : i32, i32
  }
  func.func @transform_2(%arg0: i32) -> (i32, i32) {
    %c0_i32 = arith.constant 0 : i32
    %c0_i32_0 = arith.constant 0 : i32
    %c0_i32_1 = arith.constant 0 : i32
    return %c0_i32, %c0_i32_0 : i32, i32
  }
  func.func @transform_3(%arg0: i32) -> (i32, i32) {
    %c0_i32 = arith.constant 0 : i32
    %c0_i32_0 = arith.constant 0 : i32
    %c0_i32_1 = arith.constant 0 : i32
    return %c0_i32, %c0_i32_0 : i32, i32
  }
  func.func @transform_4(%arg0: i32) -> (i32, i32) {
    %c0_i32 = arith.constant 0 : i32
    %c0_i32_0 = arith.constant 0 : i32
    %c0_i32_1 = arith.constant 0 : i32
    return %c0_i32, %c0_i32_0 : i32, i32
  }
  func.func @transform_5(%arg0: i32) -> (i32, i32) {
    %c0_i32 = arith.constant 0 : i32
    %c0_i32_0 = arith.constant 0 : i32
    %c0_i32_1 = arith.constant 0 : i32
    return %c0_i32, %c0_i32_0 : i32, i32
  }
  func.func @transform_6(%arg0: i32) -> (i32, i32) {
    %c0_i32 = arith.constant 0 : i32
    %c0_i32_0 = arith.constant 0 : i32
    %c0_i32_1 = arith.constant 0 : i32
    return %c0_i32, %c0_i32_0 : i32, i32
  }
  func.func @transform_7(%arg0: i32) -> (i32, i32) {
    %c0_i32 = arith.constant 0 : i32
    %c0_i32_0 = arith.constant 0 : i32
    return %arg0, %c0_i32 : i32, i32
  }
}

</mosaic_0001>

<bundles_post_ra>
// kernel: tpu_custom_call.1
= control target key start
LH: loop header
LB: loop body
LE: loop exit
PB: predicated region body
PF: predicated region fallthrough
CT: control target
= control target key end

     0   :  { %12 = vsyncpa [#allocation3], 0  ;;  %s744_s0 = inlined_call_operand.hbm [shape: f32[8,32], index: 0, kind: input, shape index: {}]   ;;  %s745_s1 = inlined_call_operand.hbm [shape: bf16[32,128], index: 1, kind: input, shape index: {}]   ;;  %s746_s2 = inlined_call_operand.vmem [shape: f32[1,128], index: 2, kind: input, shape index: {}]   ;;  %s747_s3 = inlined_call_operand.hbm [shape: bf16[128,128], index: 3, kind: input, shape index: {}]   ;;  %s748_s4 = inlined_call_operand.vmem [shape: f32[1,128], index: 4, kind: input, shape index: {}]   ;;  %s749_s5 = inlined_call_operand.hbm [shape: bf16[128,128], index: 5, kind: input, shape index: {}]   ;;  %s750_s6 = inlined_call_operand.vmem [shape: f32[1,128], index: 6, kind: input, shape index: {}]   ;;  %s751_s7 = inlined_call_operand.hbm [shape: f32[8,8], index: 7, kind: output, shape index: {}]  }
   0x1   :  { %13 = vsyncpa [#allocation6], 0 }
   0x2   :  { %14 = vsyncpa [#allocation9], 0 }
   0x3   :  { %15 = vsyncpa [#allocation4], 0  ;;  %s638_s24 = smov [#allocation5]  }
   0x4   :  { %s31_s25 = sshll.u32 %s638_s24, 4  ;;  %s32_s25 = int_to_ptr.vmem [resolvable:$true] %s31_s25 }
   0x5   :  { %s538_s26 = scalar_lea.vmem %s32_s25, 256  ;;  %p543_p1 = scmp.lt.s32.totalorder %s32_s25, %s32_s25 }
   0x6   :  { %p539_p0 = scmp.ne.s32.totalorder %s32_s25, %s538_s26  ;;  %p544_p2 = scmp.lt.s32.totalorder %s538_s26, %s538_s26 }
   0x8   :  { %p545_p3 = por %p544_p2, %p543_p1 }
   0xa   :  { %p546_p4 = pnand %p545_p3, %p539_p0 }
   0xc   :  { %549 = shalt.err (!%p546_p4)
}
   0xd   :  { %s639_s27 = smov 64   ;;  %s640_s28 = smov 4  }
   0xe   :  { %37 = dma.hbm_to_vmem [thread:$0]  %s745_s1, 256, %s32_s25, [#allocation6], %s639_s27, %s639_s27, %s640_s28  }
   0xf   :  { %s641_s8 = smov [#allocation2]   ;;  %s642_s10 = smov [#allocation7]  }
  0x10   :  { %s22_s9 = sshll.u32 %s641_s8, 4  ;;  %s45_s11 = sshll.u32 %s642_s10, 4  ;;  %s23_s9 = int_to_ptr.vmem [resolvable:$true] %s22_s9  ;;  %s46_s11 = int_to_ptr.vmem [resolvable:$true] %s45_s11 }
  0x11   :  { %s558_s12 = scalar_lea.vmem %s23_s9, 128  ;;  %p563_p6 = scmp.lt.s32.totalorder %s23_s9, %s23_s9 }
  0x12   :  { %p559_p5 = scmp.ne.s32.totalorder %s23_s9, %s558_s12  ;;  %p564_p7 = scmp.lt.s32.totalorder %s558_s12, %s558_s12 }
  0x14   :  { %p565_p8 = por %p564_p7, %p563_p6 }
  0x16   :  { %p566_p9 = pnand %p565_p8, %p559_p5 }
  0x18   :  { %569 = shalt.err (!%p566_p9)
}
  0x19   :  { %25 = dma.hbm_to_vmem [thread:$0]  %s744_s0, 128, %s23_s9, [#allocation3]  }
  0x1a   :  { %s578_s15 = scalar_lea.vmem %s46_s11, 1024  ;;  %p583_p11 = scmp.lt.s32.totalorder %s46_s11, %s46_s11 }
  0x1b   :  { %p579_p10 = scmp.ne.s32.totalorder %s46_s11, %s578_s15  ;;  %p584_p12 = scmp.lt.s32.totalorder %s578_s15, %s578_s15 }
  0x1d   :  { %p585_p13 = por %p584_p12, %p583_p11 }
  0x1f   :  { %p586_p0 = pnand %p585_p13, %p579_p10 }
  0x21   :  { %589 = shalt.err (!%p586_p0)
}
  0x22   :  { %51 = dma.hbm_to_vmem [thread:$0]  %s747_s3, 1024, %s46_s11, [#allocation6], %s639_s27, %s639_s27, %s640_s28  }
  0x23   :  { %s643_s17 = smov [#allocation8]  }
  0x24   :  { %s59_s18 = sshll.u32 %s643_s17, 4  ;;  %s60_s18 = int_to_ptr.vmem [resolvable:$true] %s59_s18 }
  0x25   :  { %s598_s19 = scalar_lea.vmem %s60_s18, 1024  ;;  %p603_p2 = scmp.lt.s32.totalorder %s60_s18, %s60_s18 }
  0x26   :  { %p599_p1 = scmp.ne.s32.totalorder %s60_s18, %s598_s19  ;;  %p604_p3 = scmp.lt.s32.totalorder %s598_s19, %s598_s19 }
  0x28   :  { %p605_p4 = por %p604_p3, %p603_p2 }
  0x2a   :  { %p606_p5 = pnand %p605_p4, %p599_p1 }
  0x2c   :  { %609 = shalt.err (!%p606_p5)
}
  0x2d   :  { %65 = dma.hbm_to_vmem [thread:$0]  %s749_s5, 1024, %s60_s18, [#allocation9], %s639_s27, %s639_s27, %s640_s28  }
  0x2e   :  { %630 = dma.done.wait [#allocation3], 128  }
  0x2f   :  { %631 = vsyncadd [#allocation3], 4294967168 }
  0x30   :  { %632 = dma.done.wait [#allocation6], 1280  }
  0x31   :  { %633 = vsyncadd [#allocation6], 4294966016 }
  0x32   :  { %634 = dma.done.wait [#allocation9], 1024  }
  0x33   :  { %635 = vsyncadd [#allocation9], 4294966272  ;;  %v644_v0 = vmov 0.0   ;;  %vm645_vm0 = vmmov 0   ;;  %v508_v1 = vld [vmem:[#allocation5 + $0x8] sm:$0xff]   ;;  %v509_v2 = vld [vmem:[#allocation5] sm:$0xff]   ;;  %v376_v37 = vlaneseq }
  0x34   :  { %451 = vmatprep.subr.bf16.mxu0 %v644_v0  ;;  %455 = vmatprep.mubr.msk.bf16.mxu0 %vm645_vm0, %v644_v0  ;;  %v81_v3 = vld [vmem:[#allocation2] sm:$0xff]  ;;  %v510_v4 = vld [vmem:[#allocation7 + $0x38] sm:$0xff]   ;;  %v511_v6 = vld [vmem:[#allocation7 + $0x30] sm:$0xff]   ;;  %vm106_vm1 = vcmask 261120   ;;  %vm389_vm3 = vcmask 64512  }
  0x35   :  { %459 = vmatprep.subr.bf16.mxu1 %v644_v0  ;;  %475 = vmatprep.mubr.msk.bf16.mxu1 %vm645_vm0, %v644_v0  ;;  %v82_v5 = vpack.c.bf16 %v81_v3, %v81_v3  ;;  %v512_v7 = vld [vmem:[#allocation7 + $0x28] sm:$0xff]   ;;  %v513_v8 = vld [vmem:[#allocation7 + $0x20] sm:$0xff]   ;;  %v514_v9 = vld [vmem:[#allocation7 + $0x18] sm:$0xff]   ;;  %v377_v38 = vand.u32 127, %v376_v37 }
  0x36   :  { %452 = vmatpush3.bf16.msra.mxu0 %v508_v1  ;;  %460 = vmatpush3.bf16.msra.mxu1 %v510_v4  ;;  %v515_v10 = vld [vmem:[#allocation7 + $0x10] sm:$0xff]   ;;  %v516_v11 = vld [vmem:[#allocation7 + $0x8] sm:$0xff]   ;;  %v517_v12 = vld [vmem:[#allocation7] sm:$0xff]  }
  0x37   :  { %453 = vmatprep.subr.bf16.mxu0 %v644_v0  ;;  %461 = vmatprep.subr.bf16.mxu1 %v644_v0  ;;  %v518_v13 = vld [vmem:[#allocation8 + $0x38] sm:$0xff]   ;;  %v519_v14 = vld [vmem:[#allocation8 + $0x30] sm:$0xff]   ;;  %v520_v15 = vld [vmem:[#allocation8 + $0x28] sm:$0xff]   ;;  %vm378_vm2 = vcmp.lt.s32.totalorder %v377_v38, 8 }
  0x38   :  { %v521_v16 = vld [vmem:[#allocation8 + $0x20] sm:$0xff]   ;;  %v522_v17 = vld [vmem:[#allocation8 + $0x18] sm:$0xff]   ;;  %v523_v18 = vld [vmem:[#allocation8 + $0x10] sm:$0xff]  }
  0x39   :  { %v408_v19 = vld [vmem:[%s746_s2] ss:$0 sm:$0xff]  ;;  %v525_v28 = vld [vmem:[#allocation8] sm:$0xff]  }
  0x3a   :  { %454 = vmatpush3.bf16.msra.mxu0 %v509_v2  ;;  %462 = vmatpush3.bf16.msra.mxu1 %v511_v6  ;;  %v524_v27 = vld [vmem:[#allocation8 + $0x8] sm:$0xff]  }
  0x3b   :  { %479 = vmatprep.subr.bf16.mxu0 %v644_v0  ;;  %463 = vmatprep.subr.bf16.mxu1 %v644_v0  ;;  %v412_v29 = vld [vmem:[%s748_s4] ss:$0 sm:$0xff]  ;;  %s646_s4 = smov [#allocation10]  }
  0x3c   :  { %v421_v39 = vld [vmem:[%s750_s6] ss:$0 sm:$0xff]  ;;  %s397_s24 = sshll.u32 %s646_s4, 4  ;;  %s398_s24 = int_to_ptr.vmem [resolvable:$true] %s397_s24 }
  0x3d   :  { %456 = vmatmul.mubr.msk.bf16.vlgmr.msra.gmra.mxu0 %vm106_vm1, %v82_v5  ;;  %s610_s6 = scalar_lea.vmem %s398_s24, 128  ;;  %p615_p7 = scmp.lt.s32.totalorder %s398_s24, %s398_s24 }
  0x3e   :  { %495 = vmatprep.mubr.msk.bf16.mxu0 %vm645_vm0, %v644_v0  ;;  %464 = vmatpush3.bf16.msra.mxu1 %v512_v7  ;;  %p611_p6 = scmp.ne.s32.totalorder %s398_s24, %s610_s6  ;;  %p616_p8 = scmp.lt.s32.totalorder %s610_s6, %s610_s6 }
  0x3f   :  { %465 = vmatprep.subr.bf16.mxu1 %v644_v0  ;;  %480 = vmatpush3.bf16.msra.mxu0 %v518_v13 }
  0x40   :  { %481 = vmatprep.subr.bf16.mxu0 %v644_v0  ;;  %p617_p9 = por %p616_p8, %p615_p7 }
  0x42   :  { %466 = vmatpush3.bf16.msra.mxu1 %v513_v8  ;;  %p618_p10 = pnand %p617_p9, %p611_p6 }
  0x43   :  { %467 = vmatprep.subr.bf16.mxu1 %v644_v0  ;;  %482 = vmatpush3.bf16.msra.mxu0 %v519_v14 }
  0x44   :  { %483 = vmatprep.subr.bf16.mxu0 %v644_v0 }
  0x46   :  { %468 = vmatpush3.bf16.msra.mxu1 %v514_v9 }
  0x47   :  { %469 = vmatprep.subr.bf16.mxu1 %v644_v0  ;;  %484 = vmatpush3.bf16.msra.mxu0 %v520_v15 }
  0x48   :  { %485 = vmatprep.subr.bf16.mxu0 %v644_v0 }
  0x4a   :  { %470 = vmatpush3.bf16.msra.mxu1 %v515_v10 }
  0x4b   :  { %471 = vmatprep.subr.bf16.mxu1 %v644_v0  ;;  %486 = vmatpush3.bf16.msra.mxu0 %v521_v16 }
  0x4c   :  { %487 = vmatprep.subr.bf16.mxu0 %v644_v0 }
  0x4e   :  { %472 = vmatpush3.bf16.msra.mxu1 %v516_v11 }
  0x4f   :  { %473 = vmatprep.subr.bf16.mxu1 %v644_v0  ;;  %488 = vmatpush3.bf16.msra.mxu0 %v522_v17 }
  0x50   :  { %489 = vmatprep.subr.bf16.mxu0 %v644_v0 }
  0x52   :  { %474 = vmatpush3.bf16.msra.mxu1 %v517_v12 }
  0x53   :  { %490 = vmatpush3.bf16.msra.mxu0 %v523_v18 }
  0x54   :  { %491 = vmatprep.subr.bf16.mxu0 %v644_v0 }
  0x57   :  { %492 = vmatpush3.bf16.msra.mxu0 %v524_v27 }
  0x58   :  { %493 = vmatprep.subr.bf16.mxu0 %v644_v0 }
  0x5b   :  { %494 = vmatpush3.bf16.msra.mxu0 %v525_v28 }
  0xfd   :  { %v144_v20 = vpop.f32.mrf.mxu0 }
  0xfe   :  { %v145_v21 = vadd.f32 %v408_v19, %v144_v20 }
  0xff   :  { %v457_v22 = vpop.f32.mrf.mxu0 }
 0x100   :  { %v150_v23 = vmax.f32 %v145_v21, 0.0 }
 0x101   :  { %v147_v24 = vpop.f32.mrf.mxu0 }
 0x102   :  { %v151_v25 = vpack.c.bf16 %v150_v23, %v150_v23 }
 0x103   :  { %v458_v26 = vpop.f32.mrf.mxu0 }
 0x104   :  { %476 = vmatmul.mubr.bf16.vlgmr.msra.gmra.mxu1 %v151_v25 }
 0x1c4   :  { %v257_v30 = vpop.f32.mrf.mxu1 }
 0x1c5   :  { %v258_v31 = vadd.f32 %v412_v29, %v257_v30 }
 0x1c6   :  { %v477_v32 = vpop.f32.mrf.mxu1 }
 0x1c7   :  { %v263_v33 = vmax.f32 %v258_v31, 0.0 }
 0x1c8   :  { %v260_v34 = vpop.f32.mrf.mxu1 }
 0x1c9   :  { %v264_v35 = vpack.c.bf16 %v263_v33, %v263_v33 }
 0x1ca   :  { %v478_v36 = vpop.f32.mrf.mxu1 }
 0x1cb   :  { %496 = vmatmul.mubr.bf16.vlgmr.msra.gmra.mxu0 %v264_v35 }
 0x28b   :  { %v370_v40 = vpop.f32.mrf.mxu0 }
 0x28c   :  { %v371_v41 = vadd.f32 %v421_v39, %v370_v40 }
 0x28d   :  { %v497_v42 = vpop.f32.mrf.mxu0 }
 0x28e   :  { %v379_v43 = vsel %vm378_vm2, %v371_v41, -1e+30 }
 0x28f   :  { %380 = vmax.xlane.f32.xlu0 %v379_v43  ;;  %v373_v44 = vpop.f32.mrf.mxu0 }
 0x291   :  { %v498_v45 = vpop.f32.mrf.mxu0 }
 0x318   :  { %v381_v46 = vpop.xlane.xlu0 %380 }
 0x319   :  { %v382_v47 = vsub.f32 %v379_v43, %v381_v46 }
 0x31b   :  { %v383_v48 = vmul.f32 1.442695, %v382_v47 }
 0x31d   :  { %526 = vpow2.f32 %v383_v48 }
 0x32a   :  { %v527_v49 = vpop.eup %526 }
 0x32b   :  { %385 = vadd.xlane.f32.xlu0 %v527_v49 }
 0x3b4   :  { %v386_v50 = vpop.xlane.xlu0 %385 }
 0x3b5   :  { %528 = vrcp.f32 %v386_v50 }
 0x3c2   :  { %v529_v51 = vpop.eup %528 }
 0x3c3   :  { %v388_v52 = vmul.f32 %v529_v51, %v527_v49 }
 0x3c5   :  { %390 = vst.msk [vmem:[#allocation10] sm:$0xff] %vm389_vm3, %v388_v52 }
 0x3c6   :  { %621 = shalt.err (!%p618_p10)
}
 0x3c7   :  { %400 = dma.vmem_to_hbm [thread:$0]  %s398_s24, 128, %s751_s7, [#allocation4]  }
 0x3c8   :  { %636 = dma.done.wait [#allocation4], 128  }
 0x3c9   :  { %637 = vsyncadd [#allocation4], 4294967168 }
 0x3ca   :  { %404 = vsyncpa [#allocation3], 1 }
 0x3cb   :  { %405 = vsyncpa [#allocation6], 1 }
 0x3cc   :  { %406 = vsyncpa [#allocation9], 1 }
 0x3cd   :  { %407 = vsyncpa [#allocation4], 1 }

</bundles_post_ra>
